<compile_context>
chip_gen: v6e
topology: v6e:2x2x1
jax: 0.10.0
libtpu: 0.0.40
codegen_flags: <defaults>
</compile_context>

<pallas_src>
import jax
import jax.numpy as jnp
from jax.experimental import pallas as pl
from jax.experimental.pallas import tpu as pltpu

EPS = 1e-6  # matches torch.nn.functional.pairwise_distance default eps


def _round_up(n, m):
    return ((n + m - 1) // m) * m


def isomax_kernel(x_ref, p_ref, psq_ref, psum_ref, o_ref):
    # x_ref   : [tb, F]   features tile (native dtype)
    # p_ref   : [tc, F]   prototypes tile (native dtype, natural [C, F] layout)
    # psq_ref : [1,  tc]  precomputed sum_f p^2 (f32)
    # psum_ref: [1,  tc]  precomputed sum_f p   (f32)
    # o_ref   : [tb, tc]  logits tile
    x = x_ref[...]
    p = p_ref[...]
    f_dim = x.shape[1]

    # Cross term on the MXU: contract F of both operands, accumulate in f32.
    xp = jax.lax.dot_general(
        x, p,
        dimension_numbers=(((1,), (1,)), ((), ())),
        preferred_element_type=jnp.float32,
    )  # [tb, tc]

    # Per-row feature statistics in f32 on the VPU (cheap relative to the matmul).
    xf = x.astype(jnp.float32)
    x_sq = jnp.sum(xf * xf, axis=1, keepdims=True)   # [tb, 1]
    x_sum = jnp.sum(xf, axis=1, keepdims=True)       # [tb, 1]

    # ||x - p + eps||^2 = ||x||^2 + ||p||^2 - 2 x.p + 2*eps*(sum x - sum p) + F*eps^2
    d2 = (x_sq + psq_ref[...] - 2.0 * xp
          + (2.0 * EPS) * (x_sum - psum_ref[...])
          + jnp.float32(f_dim * EPS * EPS))
    d2 = jnp.maximum(d2, 0.0)                        # guard fp cancellation round-off
    o_ref[...] = (-jnp.sqrt(d2)).astype(o_ref.dtype)


def isomax_forward(features, prototypes, *, tb=256, tc=512):
    """features: [B, F], prototypes: [C, F]  ->  logits [B, C] (features.dtype)."""
    B, F = features.shape
    C, Fp = prototypes.shape
    if F != Fp:
        raise ValueError("feature dim mismatch between features and prototypes")

    # Hoist grid-invariant prototype statistics out of the kernel (done once, O(C*F)).
    pf32 = prototypes.astype(jnp.float32)
    p_sq = jnp.sum(pf32 * pf32, axis=1)[None, :]     # [1, C]
    p_sum = jnp.sum(pf32, axis=1)[None, :]           # [1, C]

    # Tile sizing: sublane/lane aligned, clipped to the (padded) problem size.
    tb_eff = min(_round_up(tb, 8), _round_up(B, 8))
    tc_eff = min(_round_up(tc, 128), _round_up(C, 128))   # lane-dense output tiles
    Bp = _round_up(B, tb_eff)
    Cp = _round_up(C, tc_eff)

    feats = features if Bp == B else jnp.pad(features, ((0, Bp - B), (0, 0)))
    protos = prototypes
    if Cp != C:
        protos = jnp.pad(protos, ((0, Cp - C), (0, 0)))
        p_sq = jnp.pad(p_sq, ((0, 0), (0, Cp - C)))
        p_sum = jnp.pad(p_sum, ((0, 0), (0, Cp - C)))

    grid = (Bp // tb_eff, Cp // tc_eff)

    # VMEM budget: double-buffered input/output tiles + headroom, capped at v7x's 64 MiB.
    in_bytes = jnp.dtype(features.dtype).itemsize
    p_bytes = jnp.dtype(prototypes.dtype).itemsize
    est = 2 * (tb_eff * F * in_bytes            # feature tile (x2 buffers)
               + tc_eff * F * p_bytes           # prototype tile (x2 buffers)
               + 2 * tc_eff * 4                 # p_sq + p_sum tiles
               + tb_eff * tc_eff * in_bytes)    # output tile (x2 buffers)
    vmem_limit = int(min(max(2 * est, 32 * 1024 * 1024), 64 * 1024 * 1024))

    out = pl.pallas_call(
        isomax_kernel,
        out_shape=jax.ShapeDtypeStruct((Bp, Cp), features.dtype),
        grid_spec=pltpu.PrefetchScalarGridSpec(
            num_scalar_prefetch=0,
            grid=grid,
            in_specs=[
                pl.BlockSpec((tb_eff, F), lambda i, j: (i, 0)),   # features tile
                pl.BlockSpec((tc_eff, F), lambda i, j: (j, 0)),   # prototypes tile ([C, F])
                pl.BlockSpec((1, tc_eff), lambda i, j: (0, j)),   # sum_f p^2
                pl.BlockSpec((1, tc_eff), lambda i, j: (0, j)),   # sum_f p
            ],
            out_specs=pl.BlockSpec((tb_eff, tc_eff), lambda i, j: (i, j)),
        ),
        compiler_params=pltpu.CompilerParams(
            dimension_semantics=("parallel", "parallel"),
            vmem_limit_bytes=vmem_limit,
        ),
    )(feats, protos, p_sq, p_sum)

    return out[:B, :C]


def isomax_reference(features, prototypes):
    # Direct form of F.pairwise_distance(features[:, :, None], prototypes.T[None], p=2)
    # reduced over the feature axis (the module's documented [B, C] output).
    diff = (features[:, None, :].astype(jnp.float32)
            - prototypes[None, :, :].astype(jnp.float32) + EPS)    # [B, C, F]
    return -jnp.sqrt(jnp.sum(diff * diff, axis=-1))


if __name__ == "__main__":
    key = jax.random.PRNGKey(0)
    k1, k2, k3, k4 = jax.random.split(key, 4)

    # Case 1: module as initialized (nn.init.constant_(prototypes, 0.0)).
    B, F, C = 8, 32, 16
    feats = jax.random.normal(k1, (B, F), dtype=jnp.float32)
    protos0 = jnp.zeros((C, F), dtype=jnp.float32)
    out0 = jax.block_until_ready(isomax_forward(feats, protos0))
    ref0 = isomax_reference(feats, protos0)
    assert out0.shape == (B, C)
    assert jnp.allclose(out0, ref0, rtol=2e-3, atol=1e-3), float(jnp.max(jnp.abs(out0 - ref0)))

    # Case 2: random prototypes (exercises cross term / prototype-norm paths).
    protos1 = 0.5 * jax.random.normal(k2, (C, F), dtype=jnp.float32)
    out1 = jax.block_until_ready(isomax_forward(feats, protos1))
    ref1 = isomax_reference(feats, protos1)
    assert jnp.allclose(out1, ref1, rtol=2e-3, atol=1e-3), float(jnp.max(jnp.abs(out1 - ref1)))

    # Case 3: ragged B and C (padding + multi-tile grid on both axes).
    B2, F2, C2 = 13, 64, 200
    feats2 = jax.random.normal(k3, (B2, F2), dtype=jnp.float32)
    protos2 = jax.random.normal(k4, (C2, F2), dtype=jnp.float32)
    out2 = jax.block_until_ready(isomax_forward(feats2, protos2, tb=8, tc=128))
    ref2 = isomax_reference(feats2, protos2)
    assert out2.shape == (B2, C2)
    assert jnp.allclose(out2, ref2, rtol=2e-3, atol=1e-3), float(jnp.max(jnp.abs(out2 - ref2)))

    print("KERNEL_OK")
</pallas_src>

<mosaic_0001>
module attributes {stable_mosaic.version = 11 : i64} {
  func.func @isomax_kernel(%arg0: i32, %arg1: i32, %arg2: memref<8x32xf32, #tpu.memory_space<vmem>>, %arg3: memref<128x32xf32, #tpu.memory_space<vmem>>, %arg4: memref<1x128xf32, #tpu.memory_space<vmem>>, %arg5: memref<1x128xf32, #tpu.memory_space<vmem>>, %arg6: memref<8x128xf32, #tpu.memory_space<vmem>>) attributes {dimension_semantics = [#tpu.dimension_semantics<parallel>, #tpu.dimension_semantics<parallel>], iteration_bounds = array<i64: 1, 1>, scalar_prefetch = 0 : i64, scratch_operands = 0 : i64, tpu.core_type = #tpu.core_type<tc>, window_params = [{transform_indices = @transform_0, window_bounds = array<i64: 8, 32>}, {transform_indices = @transform_1, window_bounds = array<i64: 128, 32>}, {transform_indices = @transform_2, window_bounds = array<i64: 1, 128>}, {transform_indices = @transform_3, window_bounds = array<i64: 1, 128>}, {transform_indices = @transform_4, window_bounds = array<i64: 8, 128>}]} {
    %c0 = arith.constant 0 : index
    %c0_0 = arith.constant 0 : index
    %0 = vector.load %arg2[%c0, %c0_0] : memref<8x32xf32, #tpu.memory_space<vmem>>, vector<8x32xf32>
    %c0_1 = arith.constant 0 : index
    %c0_2 = arith.constant 0 : index
    %1 = vector.load %arg3[%c0_1, %c0_2] : memref<128x32xf32, #tpu.memory_space<vmem>>, vector<128x32xf32>
    %cst = arith.constant dense<0.000000e+00> : vector<8x128xf32>
    %2 = tpu.matmul %0, %1, %cst {dimension_numbers = #tpu.dot_dimension_numbers<[1], [1], [0], [0], [0, 0, 1, 0], [], []>} : vector<8x32xf32>, vector<128x32xf32>, vector<8x128xf32> -> vector<8x128xf32>
    %3 = arith.mulf %0, %0 : vector<8x32xf32>
    %cst_3 = arith.constant dense<0.000000e+00> : vector<8xf32>
    %4 = vector.multi_reduction <add>, %3, %cst_3 [1] : vector<8x32xf32> to vector<8xf32>
    %5 = vector.shape_cast %4 : vector<8xf32> to vector<8x1xf32>
    %cst_4 = arith.constant dense<0.000000e+00> : vector<8xf32>
    %6 = vector.multi_reduction <add>, %0, %cst_4 [1] : vector<8x32xf32> to vector<8xf32>
    %7 = vector.shape_cast %6 : vector<8xf32> to vector<8x1xf32>
    %c0_5 = arith.constant 0 : index
    %c0_6 = arith.constant 0 : index
    %8 = vector.load %arg4[%c0_5, %c0_6] : memref<1x128xf32, #tpu.memory_space<vmem>>, vector<1x128xf32>
    %9 = vector.broadcast %5 : vector<8x1xf32> to vector<8x128xf32>
    %10 = vector.broadcast %8 : vector<1x128xf32> to vector<8x128xf32>
    %11 = arith.addf %9, %10 : vector<8x128xf32>
    %cst_7 = arith.constant 2.000000e+00 : f32
    %12 = vector.broadcast %cst_7 : f32 to vector<8x128xf32>
    %13 = arith.mulf %12, %2 : vector<8x128xf32>
    %14 = arith.subf %11, %13 : vector<8x128xf32>
    %c0_8 = arith.constant 0 : index
    %c0_9 = arith.constant 0 : index
    %15 = vector.load %arg5[%c0_8, %c0_9] : memref<1x128xf32, #tpu.memory_space<vmem>>, vector<1x128xf32>
    %16 = vector.broadcast %7 : vector<8x1xf32> to vector<8x128xf32>
    %17 = vector.broadcast %15 : vector<1x128xf32> to vector<8x128xf32>
    %18 = arith.subf %16, %17 : vector<8x128xf32>
    %cst_10 = arith.constant 2.000000e-06 : f32
    %19 = vector.broadcast %cst_10 : f32 to vector<8x128xf32>
    %20 = arith.mulf %19, %18 : vector<8x128xf32>
    %21 = arith.addf %14, %20 : vector<8x128xf32>
    %cst_11 = arith.constant 3.200000e-11 : f32
    %22 = vector.broadcast %cst_11 : f32 to vector<8x128xf32>
    %23 = arith.addf %21, %22 : vector<8x128xf32>
    %cst_12 = arith.constant 0.000000e+00 : f32
    %24 = vector.broadcast %cst_12 : f32 to vector<8x128xf32>
    %25 = arith.maximumf %23, %24 : vector<8x128xf32>
    %26 = math.sqrt %25 : vector<8x128xf32>
    %cst_13 = arith.constant 0.000000e+00 : f32
    %27 = vector.broadcast %cst_13 : f32 to vector<8x128xf32>
    %28 = arith.subf %27, %26 : vector<8x128xf32>
    %c0_14 = arith.constant 0 : index
    %c0_15 = arith.constant 0 : index
    %29 = vector.load %arg6[%c0_14, %c0_15] : memref<8x128xf32, #tpu.memory_space<vmem>>, vector<8x128xf32>
    tpu.vector_store %arg6[%c0_14, %c0_15], %28 {strides = array<i32>} : memref<8x128xf32, #tpu.memory_space<vmem>>, vector<8x128xf32>,
    return
  }
  func.func @transform_0(%arg0: i32, %arg1: i32) -> (i32, i32) {
    %c0_i32 = arith.constant 0 : i32
    %c0_i32_0 = arith.constant 0 : i32
    return %arg0, %c0_i32 : i32, i32
  }
  func.func @transform_1(%arg0: i32, %arg1: i32) -> (i32, i32) {
    %c0_i32 = arith.constant 0 : i32
    %c0_i32_0 = arith.constant 0 : i32
    return %arg1, %c0_i32 : i32, i32
  }
  func.func @transform_2(%arg0: i32, %arg1: i32) -> (i32, i32) {
    %c0_i32 = arith.constant 0 : i32
    %c0_i32_0 = arith.constant 0 : i32
    return %c0_i32, %arg1 : i32, i32
  }
  func.func @transform_3(%arg0: i32, %arg1: i32) -> (i32, i32) {
    %c0_i32 = arith.constant 0 : i32
    %c0_i32_0 = arith.constant 0 : i32
    return %c0_i32, %arg1 : i32, i32
  }
  func.func @transform_4(%arg0: i32, %arg1: i32) -> (i32, i32) {
    %c0_i32 = arith.constant 0 : i32
    return %arg0, %arg1 : i32, i32
  }
}

</mosaic_0001>

<bundles_post_ra>
// kernel: tpu_custom_call.1
= control target key start
LH: loop header
LB: loop body
LE: loop exit
PB: predicated region body
PF: predicated region fallthrough
CT: control target
= control target key end

     0   :  { %vm35_vm0 = vcmask 261120   ;;  %v307_v1 = vmov 0.0   ;;  %vm308_vm1 = vmmov 0   ;;  %s414_s0 = inlined_call_operand.vmem [shape: f32[8,32], index: 0, kind: input, shape index: {}]   ;;  %s415_s1 = inlined_call_operand.vmem [shape: f32[128,32], index: 1, kind: input, shape index: {}]   ;;  %s416_s2 = inlined_call_operand.vmem [shape: f32[1,128], index: 2, kind: input, shape index: {}]   ;;  %s417_s3 = inlined_call_operand.vmem [shape: f32[1,128], index: 3, kind: input, shape index: {}]   ;;  %s418_s4 = inlined_call_operand.hbm [shape: f32[8,128], index: 4, kind: output, shape index: {}]  }
   0x1   :  { %v34_v0 = vld [vmem:[%s415_s1 + $0x78] sm:$0xff]  ;;  %245 = vmatprep.subr.mxu0 %v307_v1  ;;  %277 = vmatprep.mubr.msk.f32.mxu0 %vm308_vm1, %v307_v1  ;;  %v33_v2 = vld [vmem:[%s415_s1 + $0x70] sm:$0xff]  ;;  %v18_v3 = vld [vmem:[%s414_s0] sm:$0xff] }
   0x2   :  { %246 = vmatpush3.xpose.msk.msra.mxu0 %vm35_vm0, %v34_v0  ;;  %v157_v4 = vmul.f32 %v18_v3, %v18_v3 }
   0x3   :  { %247 = vmatprep.subr.mxu0 %v307_v1 }
   0x6   :  { %248 = vmatpush3.xpose.msk.msra.mxu0 %vm35_vm0, %v33_v2 }
   0x7   :  { %9 = vsyncpa [#allocation3], 0  ;;  %249 = vmatprep.subr.mxu0 %v307_v1  ;;  %v32_v5 = vld [vmem:[%s415_s1 + $0x68] sm:$0xff]  ;;  %v158_v6 = vsel %vm35_vm0, %v157_v4, 0.0  ;;  %v161_v7 = vsel %vm35_vm0, %v18_v3, 0.0  ;;  %v31_v8 = vld [vmem:[%s415_s1 + $0x60] sm:$0xff] }
   0x8   :  { %159 = vadd.xlane.f32.xlu0 %v158_v6  ;;  %v30_v9 = vld [vmem:[%s415_s1 + $0x58] sm:$0xff]  ;;  %v29_v10 = vld [vmem:[%s415_s1 + $0x50] sm:$0xff]  ;;  %v28_v11 = vld [vmem:[%s415_s1 + $0x48] sm:$0xff] }
   0x9   :  { %v27_v12 = vld [vmem:[%s415_s1 + $0x40] sm:$0xff]  ;;  %v26_v13 = vld [vmem:[%s415_s1 + $0x38] sm:$0xff]  ;;  %v25_v14 = vld [vmem:[%s415_s1 + $0x30] sm:$0xff] }
   0xa   :  { %250 = vmatpush3.xpose.msk.msra.mxu0 %vm35_vm0, %v32_v5  ;;  %v24_v15 = vld [vmem:[%s415_s1 + $0x28] sm:$0xff]  ;;  %v23_v16 = vld [vmem:[%s415_s1 + $0x20] sm:$0xff]  ;;  %v22_v17 = vld [vmem:[%s415_s1 + $0x18] sm:$0xff] }
   0xb   :  { %251 = vmatprep.subr.mxu0 %v307_v1  ;;  %v21_v18 = vld [vmem:[%s415_s1 + $0x10] sm:$0xff]  ;;  %v20_v19 = vld [vmem:[%s415_s1 + $0x8] sm:$0xff]  ;;  %v19_v20 = vld [vmem:[%s415_s1] sm:$0xff]  ;;  %s309_s1 = smov [#allocation2]  }
   0xc   :  { %162 = vadd.xlane.f32.xlu0 %v161_v7  ;;  %v227_v22 = vld [vmem:[%s417_s3] ss:$0 sm:$0xff]  ;;  %s201_s3 = sshll.u32 %s309_s1, 4  ;;  %s202_s3 = int_to_ptr.vmem [resolvable:$true] %s201_s3 }
   0xd   :  { %v226_v25 = vld [vmem:[%s416_s2] ss:$0 sm:$0xff]  ;;  %s285_s2 = scalar_lea.vmem %s202_s3, 128  ;;  %p290_p1 = scmp.lt.s32.totalorder %s202_s3, %s202_s3 }
   0xe   :  { %252 = vmatpush3.xpose.msk.msra.mxu0 %vm35_vm0, %v31_v8  ;;  %p286_p0 = scmp.ne.s32.totalorder %s202_s3, %s285_s2  ;;  %p291_p2 = scmp.lt.s32.totalorder %s285_s2, %s285_s2 }
   0xf   :  { %253 = vmatprep.subr.mxu0 %v307_v1 }
  0x10   :  { %p292_p3 = por %p291_p2, %p290_p1 }
  0x12   :  { %254 = vmatpush3.xpose.msk.msra.mxu0 %vm35_vm0, %v30_v9  ;;  %p293_p4 = pnand %p292_p3, %p286_p0 }
  0x13   :  { %255 = vmatprep.subr.mxu0 %v307_v1 }
  0x16   :  { %256 = vmatpush3.xpose.msk.msra.mxu0 %vm35_vm0, %v29_v10 }
  0x17   :  { %257 = vmatprep.subr.mxu0 %v307_v1 }
  0x1a   :  { %258 = vmatpush3.xpose.msk.msra.mxu0 %vm35_vm0, %v28_v11 }
  0x1b   :  { %259 = vmatprep.subr.mxu0 %v307_v1 }
  0x1e   :  { %260 = vmatpush3.xpose.msk.msra.mxu0 %vm35_vm0, %v27_v12 }
  0x1f   :  { %261 = vmatprep.subr.mxu0 %v307_v1 }
  0x22   :  { %262 = vmatpush3.xpose.msk.msra.mxu0 %vm35_vm0, %v26_v13 }
  0x23   :  { %263 = vmatprep.subr.mxu0 %v307_v1 }
  0x26   :  { %264 = vmatpush3.xpose.msk.msra.mxu0 %vm35_vm0, %v25_v14 }
  0x27   :  { %265 = vmatprep.subr.mxu0 %v307_v1 }
  0x2a   :  { %266 = vmatpush3.xpose.msk.msra.mxu0 %vm35_vm0, %v24_v15 }
  0x2b   :  { %267 = vmatprep.subr.mxu0 %v307_v1 }
  0x2e   :  { %268 = vmatpush3.xpose.msk.msra.mxu0 %vm35_vm0, %v23_v16 }
  0x2f   :  { %269 = vmatprep.subr.mxu0 %v307_v1 }
  0x32   :  { %270 = vmatpush3.xpose.msk.msra.mxu0 %vm35_vm0, %v22_v17 }
  0x33   :  { %271 = vmatprep.subr.mxu0 %v307_v1 }
  0x36   :  { %272 = vmatpush3.xpose.msk.msra.mxu0 %vm35_vm0, %v21_v18 }
  0x37   :  { %273 = vmatprep.subr.mxu0 %v307_v1 }
  0x3a   :  { %274 = vmatpush3.xpose.msk.msra.mxu0 %vm35_vm0, %v20_v19 }
  0x3b   :  { %275 = vmatprep.subr.mxu0 %v307_v1 }
  0x3e   :  { %276 = vmatpush3.xpose.msk.msra.mxu0 %vm35_vm0, %v19_v20 }
  0x41   :  { %278 = vmatmul.mubr.msk.f32.vlgmr.msra.gmra.mxu0 %vm35_vm0, %v18_v3 }
  0x91   :  { %v160_v21 = vpop.xlane.xlu0 %159 }
  0x92   :  { %v171_v27 = vadd.f32 %v226_v25, %v160_v21 }
  0x95   :  { %v163_v23 = vpop.xlane.xlu0 %162 }
  0x96   :  { %v181_v24 = vsub.f32 %v163_v23, %v227_v22 }
  0x98   :  { %v182_v28 = vmul.f32 2e-06, %v181_v24 }
 0x101   :  { %v153_v26 = vpop.f32.mrf.mxu0 }
 0x102   :  { %v172_v29 = vmul.f32 2.0, %v153_v26 }
 0x103   :  { %v279_v30 = vpop.f32.mrf.mxu0 }
 0x104   :  { %v173_v31 = vsub.f32 %v171_v27, %v172_v29 }
 0x106   :  { %v183_v32 = vadd.f32 %v182_v28, %v173_v31 }
 0x108   :  { %v184_v33 = vadd.f32 3.2e-11, %v183_v32 }
 0x10a   :  { %v185_v34 = vmax.f32 %v184_v33, 0.0 }
 0x10c   :  { %283 = vrsqrt.f32 %v185_v34  ;;  %vm188_vm2 = vcmp.eq.f32.partialorder %v185_v34, inf  ;;  %v191_v37 = vand.u32 2147483648, %v185_v34  ;;  %vm190_vm3 = vcmp.eq.f32.partialorder %v185_v34, 0.0 }
 0x119   :  { %v284_v35 = vpop.eup %283 }
 0x11a   :  { %v187_v36 = vmul.f32 %v284_v35, %v185_v34 }
 0x11c   :  { %v189_v38 = vsel %vm188_vm2, %v185_v34, %v187_v36 }
 0x11d   :  { %v192_v39 = vsel %vm190_vm3, %v191_v37, %v189_v38 }
 0x11e   :  { %v193_v40 = vsub.f32 0.0, %v192_v39 }
 0x120   :  { %194 = vst [vmem:[#allocation2] sm:$0xff] %v193_v40 }
 0x121   :  { %296 = shalt.err (!%p293_p4)
}
 0x122   :  { %204 = dma.vmem_to_hbm [thread:$0]  %s202_s3, 128, %s418_s4, [#allocation3]  }
 0x123   :  { %305 = dma.done.wait [#allocation3], 128  }
 0x124   :  { %306 = vsyncadd [#allocation3], 4294967168 }
 0x125   :  { %208 = vsyncpa [#allocation3], 1 }

</bundles_post_ra>
